<compile_context>
chip_gen: v5e
topology: v5e:2x2
jax: 0.10.0
libtpu: 0.0.40
codegen_flags: <defaults>
</compile_context>

<pallas_src>
import functools

import jax
import jax.numpy as jnp
from jax.experimental import pallas as pl
from jax.experimental.pallas import tpu as pltpu

_LANE = 128                      # hardware lane count
_WIDE_LANES = 1024               # lane-dense last dim for large tensors
_TARGET_BLOCK_BYTES = 2 * 1024 * 1024   # ~2 MiB per block (8 MiB double-buffered)


def _apply_kernel(x_ref, o_ref, *, function):
    # Elementwise application of the wrapped function on one VMEM tile.
    o_ref[...] = function(x_ref[...]).astype(o_ref.dtype)


def _choose_layout(n, itemsize):
    """Pick (lanes, block_rows) for a flat length-n tensor."""
    # dtype-aware sublane multiple: 8 for 4-byte, 16 for 2-byte, 32 for 1-byte.
    sublane = max(8, 32 // max(int(itemsize), 1))
    # Wide lane axis only when the tensor is big enough to fill it.
    lanes = _WIDE_LANES if n >= sublane * _WIDE_LANES else _LANE
    rows = pl.cdiv(n, lanes)
    # Rows per block: target ~2 MiB, rounded to a sublane multiple.
    block_rows = min(rows, max(1, _TARGET_BLOCK_BYTES // (lanes * int(itemsize))))
    block_rows = max((block_rows // sublane) * sublane, sublane)
    return lanes, rows, block_rows


def make_apply(function):
    """Pallas equivalent of Apply(function) for elementwise `function`."""

    def forward(x):
        orig_shape = x.shape
        orig_dtype = x.dtype
        itemsize = jnp.dtype(orig_dtype).itemsize
        flat = x.reshape(-1)
        n = flat.shape[0]

        lanes, rows, block_rows = _choose_layout(n, itemsize)
        grid_steps = pl.cdiv(rows, block_rows)
        padded_rows = grid_steps * block_rows
        padded_n = padded_rows * lanes

        # Only pay pad (one extra HBM pass) on ragged inputs.
        needs_pad = padded_n != n
        if needs_pad:
            flat = jnp.pad(flat, (0, padded_n - n))
        x2d = flat.reshape(padded_rows, lanes)

        kernel = functools.partial(_apply_kernel, function=function)
        cost = pl.CostEstimate(
            flops=10 * n,
            transcendentals=n,
            bytes_accessed=2 * n * int(itemsize),
        )

        out2d = pl.pallas_call(
            kernel,
            out_shape=jax.ShapeDtypeStruct((padded_rows, lanes), orig_dtype),
            grid_spec=pltpu.PrefetchScalarGridSpec(
                num_scalar_prefetch=0,
                grid=(grid_steps,),
                in_specs=[pl.BlockSpec((block_rows, lanes), lambda i: (i, 0))],
                out_specs=pl.BlockSpec((block_rows, lanes), lambda i: (i, 0)),
            ),
            compiler_params=pltpu.CompilerParams(
                dimension_semantics=("parallel",),
            ),
            cost_estimate=cost,
        )(x2d)

        if needs_pad:
            return out2d.reshape(-1)[:n].reshape(orig_shape)
        return out2d.reshape(orig_shape)

    return forward


_INV_SQRT2 = 0.7071067811865476


def gelu_exact(x):
    # Matches torch.nn.functional.gelu default (erf-based, not tanh approx).
    # Compute in f32; multiply by 1/sqrt(2) instead of dividing (no VALU divide).
    xf = x.astype(jnp.float32)
    return 0.5 * xf * (1.0 + jax.lax.erf(xf * jnp.float32(_INV_SQRT2)))


if __name__ == "__main__":
    # Apply(gelu) on a small NCHW tensor.
    key = jax.random.PRNGKey(0)
    x = jax.random.normal(key, (2, 4, 16, 16), dtype=jnp.float32)  # NCHW

    apply_gelu = make_apply(gelu_exact)
    out = apply_gelu(x)
    out = jax.block_until_ready(out)

    # Sanity check against plain-JAX reference of the wrapped function.
    ref = gelu_exact(x)
    assert out.shape == x.shape and out.dtype == x.dtype
    assert jnp.allclose(out, ref, atol=1e-6, rtol=1e-6)

    print("KERNEL_OK")
</pallas_src>

<mosaic_0001>
module attributes {stable_mosaic.version = 11 : i64} {
  func.func @_apply_kernel(%arg0: i32, %arg1: memref<16x128xf32, #tpu.memory_space<vmem>>, %arg2: memref<16x128xf32, #tpu.memory_space<vmem>>) attributes {dimension_semantics = [#tpu.dimension_semantics<parallel>], iteration_bounds = array<i64: 1>, scalar_prefetch = 0 : i64, scratch_operands = 0 : i64, tpu.core_type = #tpu.core_type<tc>, window_params = [{transform_indices = @transform_0, window_bounds = array<i64: 16, 128>}, {transform_indices = @transform_1, window_bounds = array<i64: 16, 128>}]} {
    %c0 = arith.constant 0 : index
    %c0_0 = arith.constant 0 : index
    %0 = vector.load %arg1[%c0, %c0_0] : memref<16x128xf32, #tpu.memory_space<vmem>>, vector<16x128xf32>
    %cst = arith.constant 5.000000e-01 : f32
    %1 = vector.broadcast %cst : f32 to vector<16x128xf32>
    %2 = arith.mulf %1, %0 : vector<16x128xf32>
    %cst_1 = arith.constant 0.707106769 : f32
    %3 = vector.broadcast %cst_1 : f32 to vector<16x128xf32>
    %4 = arith.mulf %0, %3 : vector<16x128xf32>
    %5 = math.erf %4 : vector<16x128xf32>
    %cst_2 = arith.constant 1.000000e+00 : f32
    %6 = vector.broadcast %cst_2 : f32 to vector<16x128xf32>
    %7 = arith.addf %6, %5 : vector<16x128xf32>
    %8 = arith.mulf %2, %7 : vector<16x128xf32>
    %c0_3 = arith.constant 0 : index
    %c0_4 = arith.constant 0 : index
    %9 = vector.load %arg2[%c0_3, %c0_4] : memref<16x128xf32, #tpu.memory_space<vmem>>, vector<16x128xf32>
    tpu.vector_store %arg2[%c0_3, %c0_4], %8 {strides = array<i32>} : memref<16x128xf32, #tpu.memory_space<vmem>>, vector<16x128xf32>,
    return
  }
  func.func @transform_0(%arg0: i32) -> (i32, i32) {
    %c0_i32 = arith.constant 0 : i32
    %c0_i32_0 = arith.constant 0 : i32
    return %arg0, %c0_i32 : i32, i32
  }
  func.func @transform_1(%arg0: i32) -> (i32, i32) {
    %c0_i32 = arith.constant 0 : i32
    %c0_i32_0 = arith.constant 0 : i32
    return %arg0, %c0_i32 : i32, i32
  }
}

</mosaic_0001>

<bundles_post_ra>
// kernel: tpu_custom_call.1
= control target key start
LH: loop header
LB: loop body
LE: loop exit
PB: predicated region body
PF: predicated region fallthrough
CT: control target
= control target key end

     0   :  { %6 = vsyncpa [#allocation3], 0  ;;  %s242_s0 = inlined_call_operand.hbm [shape: f32[16,128], index: 0, kind: input, shape index: {}]   ;;  %s243_s1 = inlined_call_operand.hbm [shape: f32[16,128], index: 1, kind: output, shape index: {}]  }
   0x1   :  { %7 = vsyncpa [#allocation4], 0  ;;  %s12_s8 = sshll.u32 %s242_s0, 4  ;;  %s198_s9 = smov [#allocation2]   ;;  %s13_s8 = int_to_ptr.hbm [resolvable:$true] %s12_s8 }
   0x2   :  { %s14_s10 = sshll.u32 %s198_s9, 4  ;;  %s199_s11 = smov 128   ;;  %s15_s10 = int_to_ptr.vmem [resolvable:$true] %s14_s10 }
   0x3   :  { %s200_s12 = smov 8  }
   0x4   :  { %20 = dma.hbm_to_vmem [thread:$0]  %s13_s8, 256, %s15_s10, [#allocation3], %s199_s11, %s199_s11, %s200_s12  }
   0x5   :  { %194 = dma.done.wait [#allocation3], 256  }
   0x6   :  { %195 = vsyncadd [#allocation3], 4294967040  ;;  %v218_v0 = vld [vmem:[#allocation2] sm:$0xff]  ;;  %v220_v1 = vld [vmem:[#allocation2 + $0x8] sm:$0xff]  ;;  %s201_s0 = smov [#allocation5]   ;;  %s123_s16 = sshll.u32 %s243_s1, 4  ;;  %s124_s16 = int_to_ptr.hbm [resolvable:$true] %s123_s16 }
   0x7   :  { %v223_v2 = vmul.f32 0.70710677, %v218_v0  ;;  %v226_v3 = vmul.f32 0.70710677, %v220_v1  ;;  %s121_s13 = sshll.u32 %s201_s0, 4  ;;  %s122_s13 = int_to_ptr.vmem [resolvable:$true] %s121_s13 }
   0x9   :  { %v31_v4 = vmul.f32 %v223_v2, %v223_v2  ;;  %v71_v5 = vmul.f32 %v226_v3, %v226_v3 }
   0xb   :  { %v32_v6 = vmin.f32 %v31_v4, 16.0  ;;  %v72_v7 = vmin.f32 %v71_v5, 16.0 }
   0xd   :  { %v33_v8 = vmul.f32 2.1237322e-06, %v32_v6  ;;  %v44_v9 = vmul.f32 3.8918573e-05, %v32_v6  ;;  %v73_v10 = vmul.f32 2.1237322e-06, %v72_v7 }
   0xe   :  { %v84_v11 = vmul.f32 3.8918573e-05, %v72_v7 }
   0xf   :  { %v34_v12 = vadd.f32 0.00028619796, %v33_v8  ;;  %v45_v13 = vadd.f32 0.001143296, %v44_v9  ;;  %v74_v14 = vadd.f32 0.00028619796, %v73_v10 }
  0x10   :  { %v85_v15 = vadd.f32 0.001143296, %v84_v11 }
  0x11   :  { %v35_v16 = vmul.f32 %v34_v12, %v32_v6  ;;  %v46_v17 = vmul.f32 %v45_v13, %v32_v6  ;;  %v75_v18 = vmul.f32 %v74_v14, %v72_v7  ;;  %v27_v12 = vmul.f32 0.5, %v218_v0 }
  0x12   :  { %v86_v19 = vmul.f32 %v85_v15, %v72_v7  ;;  %v28_v14 = vmul.f32 0.5, %v220_v1 }
  0x13   :  { %v36_v20 = vadd.f32 0.0036580483, %v35_v16  ;;  %v47_v21 = vadd.f32 0.014752088, %v46_v17  ;;  %v76_v22 = vadd.f32 0.0036580483, %v75_v18 }
  0x14   :  { %v87_v23 = vadd.f32 0.014752088, %v86_v19 }
  0x15   :  { %v37_v24 = vmul.f32 %v36_v20, %v32_v6  ;;  %v48_v25 = vmul.f32 %v47_v21, %v32_v6  ;;  %v77_v26 = vmul.f32 %v76_v22, %v72_v7 }
  0x16   :  { %v88_v27 = vmul.f32 %v87_v23, %v72_v7 }
  0x17   :  { %v49_v28 = vadd.f32 0.112945676, %v48_v25  ;;  %v38_v29 = vadd.f32 0.05243302, %v37_v24  ;;  %v78_v32 = vadd.f32 0.05243302, %v77_v26 }
  0x18   :  { %v89_v30 = vadd.f32 0.112945676, %v88_v27 }
  0x19   :  { %v50_v31 = vmul.f32 %v49_v28, %v32_v6  ;;  %v39_v35 = vmul.f32 %v38_v29, %v32_v6  ;;  %v79_v38 = vmul.f32 %v78_v32, %v72_v7 }
  0x1a   :  { %v90_v33 = vmul.f32 %v89_v30, %v72_v7 }
  0x1b   :  { %v51_v34 = vadd.f32 0.4994258, %v50_v31  ;;  %v40_v41 = vadd.f32 0.18741608, %v39_v35  ;;  %v80_v43 = vadd.f32 0.18741608, %v79_v38 }
  0x1c   :  { %v91_v36 = vadd.f32 0.4994258, %v90_v33 }
  0x1d   :  { %v52_v37 = vmul.f32 %v51_v34, %v32_v6  ;;  %v41_v44 = vmul.f32 %v40_v41, %v32_v6  ;;  %v81_v45 = vmul.f32 %v80_v43, %v72_v7 }
  0x1e   :  { %v92_v39 = vmul.f32 %v91_v36, %v72_v7 }
  0x1f   :  { %v53_v40 = vadd.f32 1.0, %v52_v37  ;;  %v42_v48 = vadd.f32 1.1283791, %v41_v44  ;;  %v82_v51 = vadd.f32 1.1283791, %v81_v45 }
  0x20   :  { %v93_v42 = vadd.f32 1.0, %v92_v39 }
  0x21   :  { %142 = vrcp.f32 %v53_v40  ;;  %vm59_vm0 = vweird.f32 %v53_v40  ;;  %v65_v50 = vand.u32 2147483648, %v53_v40  ;;  %v63_v54 = vand.u32 2147483647, %v53_v40 }
  0x22   :  { %144 = vrcp.f32 %v93_v42  ;;  %v105_v55 = vand.u32 2147483648, %v93_v42  ;;  %vm99_vm2 = vweird.f32 %v93_v42  ;;  %v103_v57 = vand.u32 2147483647, %v93_v42 }
  0x23   :  { %v66_v59 = vor.u32 1.1754944e-38, %v65_v50  ;;  %v43_v61 = vmul.f32 %v42_v48, %v223_v2  ;;  %vm64_vm5 = vcmp.eq.f32.partialorder %v63_v54, 8.507059e+37  ;;  %v83_v4 = vmul.f32 %v82_v51, %v226_v3 }
  0x24   :  { %v106_v63 = vor.u32 1.1754944e-38, %v105_v55  ;;  %vm104_vm7 = vcmp.eq.f32.partialorder %v103_v57, 8.507059e+37 }
  0x27   :  { %v143_v46 = vpop.eup %142 }
  0x28   :  { %v145_v47 = vpop.eup %144  ;;  %v55_v49 = vmul.f32 %v143_v46, %v53_v40  ;;  %vm60_vm1 = vweird.f32 %v143_v46 }
  0x29   :  { %v95_v52 = vmul.f32 %v145_v47, %v93_v42  ;;  %vm100_vm3 = vweird.f32 %v145_v47  ;;  %vm61_vm4 = vmor %vm59_vm0, %vm60_vm1 }
  0x2a   :  { %v56_v53 = vsub.f32 1.0, %v55_v49  ;;  %vm101_vm6 = vmor %vm99_vm2, %vm100_vm3 }
  0x2b   :  { %v96_v56 = vsub.f32 1.0, %v95_v52 }
  0x2c   :  { %v57_v58 = vmul.f32 %v143_v46, %v56_v53 }
  0x2d   :  { %v97_v60 = vmul.f32 %v145_v47, %v96_v56 }
  0x2e   :  { %v58_v62 = vadd.f32 %v143_v46, %v57_v58 }
  0x2f   :  { %v98_v5 = vadd.f32 %v145_v47, %v97_v60 }
  0x30   :  { %v62_v6 = vsel %vm61_vm4, %v143_v46, %v58_v62 }
  0x31   :  { %v67_v7 = vsel %vm64_vm5, %v66_v59, %v62_v6  ;;  %v102_v8 = vsel %vm101_vm6, %v145_v47, %v98_v5 }
  0x32   :  { %v68_v9 = vmul.f32 %v67_v7, %v43_v61  ;;  %v107_v10 = vsel %vm104_vm7, %v106_v63, %v102_v8 }
  0x33   :  { %v108_v11 = vmul.f32 %v107_v10, %v83_v4 }
  0x34   :  { %v136_v13 = vclamps-f32 %v68_v9, 1.0 }
  0x35   :  { %v137_v2 = vclamps-f32 %v108_v11, 1.0 }
  0x36   :  { %v111_v15 = vadd.f32 1.0, %v136_v13 }
  0x37   :  { %v112_v3 = vadd.f32 1.0, %v137_v2 }
  0x38   :  { %v113_v16 = vmul.f32 %v111_v15, %v27_v12 }
  0x39   :  { %v114_v17 = vmul.f32 %v112_v3, %v28_v14 }
  0x3a   :  { %115 = vst [vmem:[#allocation5] sm:$0xff] %v113_v16 }
  0x3b   :  { %116 = vst [vmem:[#allocation5 + $0x8] sm:$0xff] %v114_v17 }
  0x3c   :  { %129 = dma.vmem_to_hbm [thread:$0]  %s122_s13, 256, %s124_s16, [#allocation4], %s199_s11, %s199_s11, %s200_s12  }
  0x3d   :  { %196 = dma.done.wait [#allocation4], 256  }
  0x3e   :  { %197 = vsyncadd [#allocation4], 4294967040 }
  0x3f   :  { %134 = vsyncpa [#allocation3], 1 }
  0x40   :  { %135 = vsyncpa [#allocation4], 1 }

</bundles_post_ra>
